<compile_context>
chip_gen: v6e
topology: v6e:2x2x1
jax: 0.10.0
libtpu: 0.0.40
codegen_flags: <defaults>
</compile_context>

<pallas_src>
import functools

import jax
import jax.numpy as jnp
from jax.experimental import pallas as pl
from jax.experimental.pallas import tpu as pltpu


def _sap_kernel(x_ref, w_ref, b_ref, *rest, has_mask):
    # x_ref: (NB, T, H)       batch rows for this grid step
    # w_ref: (1, 1, H)        Linear weight as a lane-dense row (grid-resident)
    # b_ref: (1,)             Linear bias, SMEM scalar
    # rest : [m_ref: (NB, T, 1) int32 mask]  +  o_ref: (NB, 1, H)
    if has_mask:
        m_ref, o_ref = rest
    else:
        (o_ref,) = rest

    x = x_ref[...].astype(jnp.float32)                     # (NB, T, H)
    w = w_ref[...].astype(jnp.float32)                     # (1, 1, H)

    # att_logits = x @ W.T + b  -- lane-wise multiply + cross-lane (XLU) reduction;
    # keepdims keeps the natural T-in-sublanes orientation for everything below.
    logits = jnp.sum(x * w, axis=-1, keepdims=True) + b_ref[0]   # (NB, T, 1)

    if has_mask:
        logits = logits + jnp.where(m_ref[...] != 0,
                                    jnp.float32(0.0),
                                    jnp.float32(-10000000.0))    # (NB, T, 1)

    # Numerically stable softmax over T (sublane axis), matching torch.softmax.
    mx = jnp.max(logits, axis=1, keepdims=True)            # (NB, 1, 1)
    e = jnp.exp(logits - mx)                               # (NB, T, 1)
    denom = jnp.sum(e, axis=1, keepdims=True)              # (NB, 1, 1)
    att = e * pl.reciprocal(denom, approx=True)            # EUP reciprocal (~free)

    # utter_rep = sum_T(batch_rep * att_w): f32 VPU multiply + sublane reduction.
    pooled = jnp.sum(x * att, axis=1, keepdims=True)       # (NB, 1, H)
    o_ref[...] = pooled.astype(o_ref.dtype)


def _choose_block_rows(n, t, h, itemsize):
    """Rows per grid step: large double-buffered tiles that stay inside scoped VMEM."""
    # Per-row VMEM of one pipeline stage: x tile + lane-padded mask + sublane-padded out.
    row_bytes = (t * h * itemsize
                 + ((t + 7) // 8) * 8 * 128 * 4
                 + 8 * ((h + 127) // 128) * 128 * 4)
    nb = int(max(1, min(4 * 1024 * 1024 // row_bytes, 512)))
    nb = min(nb, n)                       # never a block larger than the batch
    if n >= 16:                           # keep >= 2 grid steps so the "parallel"
        nb = min(nb, (n + 1) // 2)        # batch axis can split across v7x's 2 TCs
    return max(nb, 1)


def self_attention_pooling(batch_rep, weight, bias, mask=None):
    """batch_rep: (N, T, H); weight: (1, H); bias: (1,); mask: (N, T) bool or None."""
    n, t, h = batch_rep.shape
    out_dtype = batch_rep.dtype
    nb = _choose_block_rows(n, t, h, jnp.dtype(out_dtype).itemsize)
    n_pad = -(-n // nb) * nb

    x = batch_rep
    if n_pad != n:
        x = jnp.pad(x, ((0, n_pad - n), (0, 0), (0, 0)))

    w_row = jnp.asarray(weight, jnp.float32).reshape(1, 1, h)   # lane-dense weight row
    b_arr = jnp.asarray(bias, jnp.float32).reshape(1)           # SMEM scalar

    has_mask = mask is not None
    in_specs = [
        pl.BlockSpec((nb, t, h), lambda i: (i, 0, 0)),              # batch_rep tile
        pl.BlockSpec((1, 1, h), lambda i: (0, 0, 0)),               # weight (resident)
        pl.BlockSpec(memory_space=pltpu.MemorySpace.SMEM),          # bias scalar
    ]
    args = [x, w_row, b_arr]
    if has_mask:
        m_i32 = jnp.asarray(mask).astype(jnp.int32)[..., None]      # (N, T, 1) int32
        if n_pad != n:
            m_i32 = jnp.pad(m_i32, ((0, n_pad - n), (0, 0), (0, 0)),
                            constant_values=1)
        in_specs.append(pl.BlockSpec((nb, t, 1), lambda i: (i, 0, 0)))
        args.append(m_i32)

    out = pl.pallas_call(
        functools.partial(_sap_kernel, has_mask=has_mask),
        out_shape=jax.ShapeDtypeStruct((n_pad, 1, h), out_dtype),
        grid=(n_pad // nb,),
        in_specs=in_specs,
        out_specs=pl.BlockSpec((nb, 1, h), lambda i: (i, 0, 0)),
        compiler_params=pltpu.CompilerParams(
            dimension_semantics=("parallel",),
            vmem_limit_bytes=32 * 1024 * 1024,
        ),
    )(*args)
    return out[:n, 0, :]


def _reference(batch_rep, weight, bias, mask=None):
    logits = jnp.einsum("nth,h->nt", batch_rep, weight.reshape(-1)) + bias[0]
    if mask is not None:
        logits = logits + jnp.where(mask, 0.0, -10000000.0)
    att = jax.nn.softmax(logits, axis=-1)[..., None]
    return jnp.sum(batch_rep * att, axis=1)


if __name__ == "__main__":
    def run_case(n, t, h, use_mask, key):
        k_x, k_w, k_b, k_m = jax.random.split(key, 4)
        x = jax.random.normal(k_x, (n, t, h), dtype=jnp.float32)
        bound = 1.0 / (h ** 0.5)      # nn.Linear(H, 1) init range
        w = jax.random.uniform(k_w, (1, h), minval=-bound, maxval=bound,
                               dtype=jnp.float32)
        b = jax.random.uniform(k_b, (1,), minval=-bound, maxval=bound,
                               dtype=jnp.float32)
        mask = None
        if use_mask:
            mask = jax.random.bernoulli(k_m, 0.8, (n, t))
            mask = mask.at[:, 0].set(True)      # keep >= 1 valid frame per row
        out = jax.block_until_ready(self_attention_pooling(x, w, b, mask))
        ref = _reference(x, w, b, mask)
        assert out.shape == (n, h)
        # Tolerance slack only covers the approximate EUP reciprocal used for the
        # softmax normalization (typically <= 1e-3 relative error).
        err = float(jnp.max(jnp.abs(out - ref)))
        assert jnp.allclose(out, ref, atol=1e-2, rtol=1e-2), err
        return out

    key = jax.random.PRNGKey(0)
    k0, k1, k2 = jax.random.split(key, 3)
    run_case(2, 8, 32, use_mask=False, key=k0)    # module-sized case, no mask
    run_case(2, 8, 32, use_mask=True, key=k1)     # with mask
    run_case(20, 16, 128, use_mask=True, key=k2)  # multi-step grid (2 blocks of 10)
    print("KERNEL_OK")
</pallas_src>

<mosaic_0001>
module attributes {stable_mosaic.version = 11 : i64} {
  func.func @_sap_kernel(%arg0: i32, %arg1: memref<2x8x32xf32, #tpu.memory_space<vmem>>, %arg2: memref<1x1x32xf32, #tpu.memory_space<vmem>>, %arg3: memref<1xf32, #tpu.memory_space<smem>>, %arg4: memref<2x1x32xf32, #tpu.memory_space<vmem>>) attributes {dimension_semantics = [#tpu.dimension_semantics<parallel>], iteration_bounds = array<i64: 1>, scalar_prefetch = 0 : i64, scratch_operands = 0 : i64, tpu.core_type = #tpu.core_type<tc>, window_params = [{transform_indices = @transform_0, window_bounds = array<i64: 2, 8, 32>}, {pipeline_mode = #tpu.pipeline_mode<synchronous>, transform_indices = @transform_1, window_bounds = array<i64: 1, 1, 32>}, {transform_indices = @transform_2, window_bounds = array<i64: 1>}, {transform_indices = @transform_3, window_bounds = array<i64: 2, 1, 32>}]} {
    %c0 = arith.constant 0 : index
    %c0_0 = arith.constant 0 : index
    %c0_1 = arith.constant 0 : index
    %0 = vector.load %arg1[%c0, %c0_0, %c0_1] : memref<2x8x32xf32, #tpu.memory_space<vmem>>, vector<2x8x32xf32>
    %c0_2 = arith.constant 0 : index
    %c0_3 = arith.constant 0 : index
    %c0_4 = arith.constant 0 : index
    %1 = vector.load %arg2[%c0_2, %c0_3, %c0_4] : memref<1x1x32xf32, #tpu.memory_space<vmem>>, vector<1x1x32xf32>
    %2 = vector.broadcast %1 : vector<1x1x32xf32> to vector<2x8x32xf32>
    %3 = arith.mulf %0, %2 : vector<2x8x32xf32>
    %cst = arith.constant dense<0.000000e+00> : vector<2x8xf32>
    %4 = vector.multi_reduction <add>, %3, %cst [2] : vector<2x8x32xf32> to vector<2x8xf32>
    %5 = vector.shape_cast %4 : vector<2x8xf32> to vector<2x8x1xf32>
    %c0_5 = arith.constant 0 : index
    %6 = memref.load %arg3[%c0_5] : memref<1xf32, #tpu.memory_space<smem>>
    %7 = vector.broadcast %6 : f32 to vector<2x8x1xf32>
    %8 = arith.addf %5, %7 : vector<2x8x1xf32>
    %cst_6 = arith.constant dense<0xFF800000> : vector<2x1xf32>
    %9 = vector.multi_reduction <maximumf>, %8, %cst_6 [1] : vector<2x8x1xf32> to vector<2x1xf32>
    %10 = vector.shape_cast %9 : vector<2x1xf32> to vector<2x1x1xf32>
    %11 = vector.broadcast %10 : vector<2x1x1xf32> to vector<2x8x1xf32>
    %12 = arith.subf %8, %11 : vector<2x8x1xf32>
    %13 = math.exp %12 : vector<2x8x1xf32>
    %cst_7 = arith.constant dense<0.000000e+00> : vector<2x1xf32>
    %14 = vector.multi_reduction <add>, %13, %cst_7 [1] : vector<2x8x1xf32> to vector<2x1xf32>
    %15 = vector.shape_cast %14 : vector<2x1xf32> to vector<2x1x1xf32>
    %16 = tpu.reciprocal %15 {approx = true} : vector<2x1x1xf32> -> vector<2x1x1xf32>
    %17 = vector.broadcast %16 : vector<2x1x1xf32> to vector<2x8x1xf32>
    %18 = arith.mulf %13, %17 : vector<2x8x1xf32>
    %19 = vector.broadcast %18 : vector<2x8x1xf32> to vector<2x8x32xf32>
    %20 = arith.mulf %0, %19 : vector<2x8x32xf32>
    %cst_8 = arith.constant dense<0.000000e+00> : vector<2x32xf32>
    %21 = vector.multi_reduction <add>, %20, %cst_8 [1] : vector<2x8x32xf32> to vector<2x32xf32>
    %22 = vector.shape_cast %21 : vector<2x32xf32> to vector<2x1x32xf32>
    %c0_9 = arith.constant 0 : index
    %c0_10 = arith.constant 0 : index
    %c0_11 = arith.constant 0 : index
    %23 = vector.load %arg4[%c0_9, %c0_10, %c0_11] : memref<2x1x32xf32, #tpu.memory_space<vmem>>, vector<2x1x32xf32>
    tpu.vector_store %arg4[%c0_9, %c0_10, %c0_11], %22 {strides = array<i32>} : memref<2x1x32xf32, #tpu.memory_space<vmem>>, vector<2x1x32xf32>,
    return
  }
  func.func @transform_0(%arg0: i32) -> (i32, i32, i32) {
    %c0_i32 = arith.constant 0 : i32
    %c0_i32_0 = arith.constant 0 : i32
    %c0_i32_1 = arith.constant 0 : i32
    return %arg0, %c0_i32, %c0_i32_0 : i32, i32, i32
  }
  func.func @transform_1(%arg0: i32) -> (i32, i32, i32) {
    %c0_i32 = arith.constant 0 : i32
    %c0_i32_0 = arith.constant 0 : i32
    %c0_i32_1 = arith.constant 0 : i32
    %c0_i32_2 = arith.constant 0 : i32
    return %c0_i32, %c0_i32_0, %c0_i32_1 : i32, i32, i32
  }
  func.func @transform_2(%arg0: i32) -> i32 {
    %c0_i32 = arith.constant 0 : i32
    %c0_i32_0 = arith.constant 0 : i32
    return %c0_i32 : i32
  }
  func.func @transform_3(%arg0: i32) -> (i32, i32, i32) {
    %c0_i32 = arith.constant 0 : i32
    %c0_i32_0 = arith.constant 0 : i32
    %c0_i32_1 = arith.constant 0 : i32
    return %arg0, %c0_i32, %c0_i32_0 : i32, i32, i32
  }
}

</mosaic_0001>

<bundles_post_ra>
// kernel: tpu_custom_call.1
= control target key start
LH: loop header
LB: loop body
LE: loop exit
PB: predicated region body
PF: predicated region fallthrough
CT: control target
= control target key end

     0   :  { %9 = vsyncpa [#allocation4], 0  ;;  %s223_s0 = inlined_call_operand.hbm [shape: f32[2,8,32], index: 0, kind: input, shape index: {}]   ;;  %s224_s1 = inlined_call_operand.vmem [shape: f32[1,1,32], index: 1, kind: input, shape index: {}]   ;;  %s225_s2 = inlined_call_operand.<no memory space> [shape: f32[1], index: 2, kind: input, shape index: {}]   ;;  %s226_s3 = inlined_call_operand.hbm [shape: f32[2,1,32], index: 3, kind: output, shape index: {}]  }
   0x1   :  { %10 = vsyncpa [#allocation5], 0  ;;  %s181_s12 = smov [#allocation3]  }
   0x2   :  { %s16_s13 = sshll.u32 %s181_s12, 4  ;;  %s17_s13 = int_to_ptr.vmem [resolvable:$true] %s16_s13 }
   0x3   :  { %s145_s14 = scalar_lea.vmem %s17_s13, 256  ;;  %p150_p1 = scmp.lt.s32.totalorder %s17_s13, %s17_s13 }
   0x4   :  { %p146_p0 = scmp.ne.s32.totalorder %s17_s13, %s145_s14  ;;  %p151_p2 = scmp.lt.s32.totalorder %s145_s14, %s145_s14 }
   0x6   :  { %p152_p3 = por %p151_p2, %p150_p1 }
   0x8   :  { %p153_p4 = pnand %p152_p3, %p146_p0 }
   0xa   :  { %156 = shalt.err (!%p153_p4)
}
   0xb   :  { %s182_s15 = smov 128   ;;  %s183_s16 = smov 8  }
   0xc   :  { %22 = dma.hbm_to_vmem [thread:$0]  %s223_s0, 256, %s17_s13, [#allocation4], %s182_s15, %s182_s15, %s183_s16  }
   0xd   :  { %177 = dma.done.wait [#allocation4], 256  }
   0xe   :  { %178 = vsyncadd [#allocation4], 4294967040  ;;  %v30_v0 = vld [vmem:[#allocation3] sm:$0xff]  ;;  %vm41_vm0 = vcmask 261120   ;;  %v31_v2 = vld [vmem:[#allocation3 + $0x8] sm:$0xff]  ;;  %v49_v7 = vstv %s225_s2  ;;  %vm102_vm1 = vcmask 253952  }
   0xf   :  { %v122_v1 = vld [vmem:[%s224_s1] ss:$0 sm:$0xff]  ;;  %s184_s0 = smov [#allocation6]  }
  0x10   :  { %v39_v3 = vmul.f32 %v122_v1, %v30_v0  ;;  %v40_v4 = vmul.f32 %v122_v1, %v31_v2  ;;  %s110_s1 = sshll.u32 %s184_s0, 4  ;;  %s111_s1 = int_to_ptr.vmem [resolvable:$true] %s110_s1 }
  0x11   :  { %s157_s2 = scalar_lea.vmem %s111_s1, 32  ;;  %p162_p6 = scmp.lt.s32.totalorder %s111_s1, %s111_s1 }
  0x12   :  { %v42_v5 = vsel %vm41_vm0, %v39_v3, 0.0  ;;  %v45_v6 = vsel %vm41_vm0, %v40_v4, 0.0  ;;  %p158_p5 = scmp.ne.s32.totalorder %s111_s1, %s157_s2  ;;  %p163_p7 = scmp.lt.s32.totalorder %s157_s2, %s157_s2 }
  0x13   :  { %43 = vadd.xlane.f32.xlu0 %v42_v5 }
  0x14   :  { %p164_p8 = por %p163_p7, %p162_p6 }
  0x16   :  { %p165_p9 = pnand %p164_p8, %p158_p5 }
  0x17   :  { %46 = vadd.xlane.f32.xlu0 %v45_v6 }
  0x9c   :  { %v44_v8 = vpop.xlane.xlu0 %43 }
  0x9d   :  { %v50_v9 = vadd.f32 %v49_v7, %v44_v8 }
  0x9f   :  { %v52_v10 = vrot.slane %v50_v9, 4 }
  0xa0   :  { %v47_v11 = vpop.xlane.xlu0 %46 }
  0xa1   :  { %v53_v12 = vmax.f32 %v50_v9, %v52_v10  ;;  %v51_v13 = vadd.f32 %v49_v7, %v47_v11 }
  0xa3   :  { %v54_v14 = vrot.slane %v53_v12, 2  ;;  %v58_v15 = vrot.slane %v51_v13, 4 }
  0xa5   :  { %v55_v16 = vmax.f32 %v53_v12, %v54_v14  ;;  %v59_v17 = vmax.f32 %v51_v13, %v58_v15 }
  0xa7   :  { %v56_v18 = vrot.slane %v55_v16, 1  ;;  %v60_v19 = vrot.slane %v59_v17, 2 }
  0xa9   :  { %v57_v20 = vmax.f32 %v55_v16, %v56_v18  ;;  %v61_v21 = vmax.f32 %v59_v17, %v60_v19 }
  0xab   :  { %v64_v22 = vsub.f32 %v50_v9, %v57_v20  ;;  %v62_v23 = vrot.slane %v61_v21, 1 }
  0xad   :  { %v66_v24 = vmul.f32 1.442695, %v64_v22  ;;  %v63_v25 = vmax.f32 %v61_v21, %v62_v23 }
  0xaf   :  { %129 = vpow2.f32 %v66_v24  ;;  %v65_v26 = vsub.f32 %v51_v13, %v63_v25 }
  0xb1   :  { %v68_v27 = vmul.f32 1.442695, %v65_v26 }
  0xb3   :  { %131 = vpow2.f32 %v68_v27 }
  0xbc   :  { %v130_v28 = vpop.eup %129 }
  0xbd   :  { %v70_v29 = vrot.slane %v130_v28, 4 }
  0xbf   :  { %v71_v30 = vadd.f32 %v130_v28, %v70_v29 }
  0xc0   :  { %v132_v31 = vpop.eup %131 }
  0xc1   :  { %v72_v32 = vrot.slane %v71_v30, 2  ;;  %v76_v33 = vrot.slane %v132_v31, 4 }
  0xc3   :  { %v77_v34 = vadd.f32 %v132_v31, %v76_v33  ;;  %v73_v35 = vadd.f32 %v72_v32, %v71_v30 }
  0xc5   :  { %v78_v36 = vrot.slane %v77_v34, 2  ;;  %v74_v37 = vrot.slane %v73_v35, 1 }
  0xc7   :  { %v75_v38 = vadd.f32 %v74_v37, %v73_v35  ;;  %v79_v39 = vadd.f32 %v78_v36, %v77_v34 }
  0xc9   :  { %v80_v40 = vrot.slane %v79_v39, 1  ;;  %133 = vrcp.f32 %v75_v38 }
  0xcb   :  { %v81_v41 = vadd.f32 %v80_v40, %v79_v39 }
  0xcd   :  { %135 = vrcp.f32 %v81_v41 }
  0xd6   :  { %v134_v42 = vpop.eup %133 }
  0xd7   :  { %v84_v43 = vmul.f32 %v134_v42, %v130_v28 }
  0xd9   :  { %v86_v44 = vmul.f32 %v84_v43, %v30_v0 }
  0xda   :  { %v136_v45 = vpop.eup %135 }
  0xdb   :  { %v85_v46 = vmul.f32 %v136_v45, %v132_v31  ;;  %v88_v47 = vsel %vm41_vm0, %v86_v44, 0.0 }
  0xdc   :  { %v89_v48 = vrot.slane %v88_v47, 4 }
  0xdd   :  { %v87_v49 = vmul.f32 %v85_v46, %v31_v2 }
  0xde   :  { %v90_v50 = vadd.f32 %v89_v48, %v88_v47 }
  0xdf   :  { %v95_v51 = vsel %vm41_vm0, %v87_v49, 0.0 }
  0xe0   :  { %v91_v52 = vrot.slane %v90_v50, 2  ;;  %v96_v53 = vrot.slane %v95_v51, 4 }
  0xe2   :  { %v92_v54 = vadd.f32 %v91_v52, %v90_v50  ;;  %v97_v55 = vadd.f32 %v96_v53, %v95_v51 }
  0xe4   :  { %v93_v56 = vrot.slane %v92_v54, 1  ;;  %v98_v57 = vrot.slane %v97_v55, 2 }
  0xe6   :  { %v94_v58 = vadd.f32 %v93_v56, %v92_v54  ;;  %v99_v59 = vadd.f32 %v98_v57, %v97_v55 }
  0xe8   :  { %v100_v60 = vrot.slane %v99_v59, 1  ;;  %103 = vst.msk [vmem:[#allocation6] sm:$0x1] %vm102_vm1, %v94_v58 }
  0xea   :  { %v101_v61 = vadd.f32 %v100_v60, %v99_v59 }
  0xec   :  { %104 = vst.msk [vmem:[#allocation6 + $0x1] sm:$0x1] %vm102_vm1, %v101_v61 }
  0xed   :  { %168 = shalt.err (!%p165_p9)
}
  0xee   :  { %s185_s23 = smov 16   ;;  %s186_s24 = smov 1  }
  0xef   :  { %116 = dma.vmem_to_hbm [thread:$0]  %s111_s1, 32, %s226_s3, [#allocation5], %s185_s23, %s185_s23, %s186_s24  }
  0xf0   :  { %179 = dma.done.wait [#allocation5], 32  }
  0xf1   :  { %180 = vsyncadd [#allocation5], 4294967264 }
  0xf2   :  { %120 = vsyncpa [#allocation4], 1 }
  0xf3   :  { %121 = vsyncpa [#allocation5], 1 }

</bundles_post_ra>
